<compile_context>
chip_gen: v7x
topology: tpu7x:2x2x1
jax: 0.10.0
libtpu: 0.0.40
codegen_flags: <defaults>
</compile_context>

<pallas_src>
import functools

import jax
import jax.numpy as jnp
from jax.experimental import pallas as pl
from jax.experimental.pallas import tpu as pltpu


def _disc_kernel(x_ref, w1_ref, b1_ref, w2_ref, b2_ref, o_ref):
    # fc1: (TM, n_z) @ (n_z, 128) on the MXU, f32 accumulation.
    h = jnp.dot(x_ref[...], w1_ref[...], preferred_element_type=jnp.float32)
    h = jnp.maximum(h + b1_ref[...], 0.0)                     # ReLU, (TM, 128)
    # fc2: N=1 matmul wastes the MXU -> VPU multiply + XLU lane reduction.
    # w2 arrives pre-transposed as a (1, 128) row, resident in VMEM.
    y = jnp.sum(h * w2_ref[...], axis=-1, keepdims=True)      # (TM, 1)
    y = jnp.maximum(y + b2_ref[0, 0], 0.0)                    # + b2 (SMEM scalar), ReLU
    o_ref[...] = jax.nn.sigmoid(y).astype(o_ref.dtype)


def _round_up(x, m):
    return (x + m - 1) // m * m


@functools.partial(jax.jit, static_argnames=("cast_bf16", "block_rows"))
def discriminator_forward(x, w1, b1, w2, b2, *, cast_bf16=True, block_rows=512):
    """x: (B, n_z) f32; returns (B, 1) f32. Forward pass in one Pallas kernel."""
    B, n_z = x.shape
    hidden = w1.shape[1]

    tm = min(block_rows, _round_up(B, 8))       # batch tile (rows)
    b_pad = _round_up(B, tm)

    in_dtype = jnp.bfloat16 if cast_bf16 else jnp.float32
    x_in = x.astype(in_dtype)
    if b_pad != B:
        x_in = jnp.pad(x_in, ((0, b_pad - B), (0, 0)))

    w1_in = w1.astype(in_dtype)
    b1_in = b1.reshape(1, hidden).astype(jnp.float32)
    w2_row = w2.reshape(1, hidden).astype(jnp.float32)   # (hidden, 1) -> (1, hidden)
    b2_in = b2.reshape(1, 1).astype(jnp.float32)

    out = pl.pallas_call(
        _disc_kernel,
        out_shape=jax.ShapeDtypeStruct((b_pad, 1), jnp.float32),
        grid=(b_pad // tm,),
        in_specs=[
            pl.BlockSpec((tm, n_z), lambda i: (i, 0)),            # x: streamed tiles
            pl.BlockSpec((n_z, hidden), lambda i: (0, 0)),        # w1: VMEM resident
            pl.BlockSpec((1, hidden), lambda i: (0, 0)),          # b1: VMEM resident
            pl.BlockSpec((1, hidden), lambda i: (0, 0)),          # w2 row: VMEM resident
            pl.BlockSpec(memory_space=pltpu.MemorySpace.SMEM),    # b2: SMEM scalar
        ],
        out_specs=pl.BlockSpec((tm, 1), lambda i: (i, 0)),
        compiler_params=pltpu.CompilerParams(
            dimension_semantics=("parallel",),
            vmem_limit_bytes=32 * 1024 * 1024,
        ),
    )(x_in, w1_in, b1_in, w2_row, b2_in)
    return out[:B]


def init_params(key, n_z, hidden=128):
    """Deterministic init mimicking torch.nn.Linear (uniform +-1/sqrt(fan_in))."""
    k1, k2, k3, k4 = jax.random.split(key, 4)
    bound1 = 1.0 / jnp.sqrt(jnp.float32(n_z))
    bound2 = 1.0 / jnp.sqrt(jnp.float32(hidden))
    w1 = jax.random.uniform(k1, (n_z, hidden), jnp.float32, -bound1, bound1)
    b1 = jax.random.uniform(k2, (hidden,), jnp.float32, -bound1, bound1)
    w2 = jax.random.uniform(k3, (hidden, 1), jnp.float32, -bound2, bound2)
    b2 = jax.random.uniform(k4, (1,), jnp.float32, -bound2, bound2)
    return w1, b1, w2, b2


def _reference(x, w1, b1, w2, b2):
    h = jnp.maximum(x @ w1 + b1.reshape(1, -1), 0.0)
    y = jnp.maximum(h @ w2 + b2.reshape(1, 1), 0.0)
    return jax.nn.sigmoid(y)


if __name__ == "__main__":
    key = jax.random.PRNGKey(0)
    kx1, kx2, kp = jax.random.split(key, 3)

    n_z = 32
    w1, b1, w2, b2 = init_params(kp, n_z)

    # Small batch (not a multiple of 8) exercises the padding path; exact f32 path.
    x_small = jax.random.normal(kx1, (10, n_z), jnp.float32)
    out_small = discriminator_forward(x_small, w1, b1, w2, b2, cast_bf16=False)
    jax.block_until_ready(out_small)
    ref_small = _reference(x_small, w1, b1, w2, b2)
    assert out_small.shape == (10, 1)
    assert jnp.allclose(out_small, ref_small, atol=1e-5, rtol=1e-5)

    # Larger batch exercises the multi-tile grid (grid=2) + bf16 fc1 fast path.
    x_big = jax.random.normal(kx2, (1000, n_z), jnp.float32)
    out_big = discriminator_forward(x_big, w1, b1, w2, b2, cast_bf16=True)
    jax.block_until_ready(out_big)
    ref_big = _reference(x_big, w1, b1, w2, b2)
    assert out_big.shape == (1000, 1)
    assert jnp.allclose(out_big, ref_big, atol=1e-2)

    print("KERNEL_OK")
</pallas_src>

<mosaic_0001>
module attributes {stable_mosaic.version = 11 : i64} {
  func.func @_disc_kernel(%arg0: i32, %arg1: memref<16x32xf32, #tpu.memory_space<vmem>>, %arg2: memref<32x128xf32, #tpu.memory_space<vmem>>, %arg3: memref<1x128xf32, #tpu.memory_space<vmem>>, %arg4: memref<1x128xf32, #tpu.memory_space<vmem>>, %arg5: memref<1x1xf32, #tpu.memory_space<smem>>, %arg6: memref<16x1xf32, #tpu.memory_space<vmem>>) attributes {dimension_semantics = [#tpu.dimension_semantics<parallel>], iteration_bounds = array<i64: 1>, scalar_prefetch = 0 : i64, scratch_operands = 0 : i64, tpu.core_type = #tpu.core_type<tc>, window_params = [{transform_indices = @transform_0, window_bounds = array<i64: 16, 32>}, {pipeline_mode = #tpu.pipeline_mode<synchronous>, transform_indices = @transform_1, window_bounds = array<i64: 32, 128>}, {pipeline_mode = #tpu.pipeline_mode<synchronous>, transform_indices = @transform_2, window_bounds = array<i64: 1, 128>}, {pipeline_mode = #tpu.pipeline_mode<synchronous>, transform_indices = @transform_3, window_bounds = array<i64: 1, 128>}, {transform_indices = @transform_4, window_bounds = array<i64: 1, 1>}, {transform_indices = @transform_5, window_bounds = array<i64: 16, 1>}]} {
    %c0 = arith.constant 0 : index
    %c0_0 = arith.constant 0 : index
    %0 = vector.load %arg1[%c0, %c0_0] : memref<16x32xf32, #tpu.memory_space<vmem>>, vector<16x32xf32>
    %c0_1 = arith.constant 0 : index
    %c0_2 = arith.constant 0 : index
    %1 = vector.load %arg2[%c0_1, %c0_2] : memref<32x128xf32, #tpu.memory_space<vmem>>, vector<32x128xf32>
    %cst = arith.constant dense<0.000000e+00> : vector<16x128xf32>
    %2 = tpu.matmul %0, %1, %cst {dimension_numbers = #tpu.dot_dimension_numbers<[1], [0], [0], [1], [0, 0, 1, 1], [], []>} : vector<16x32xf32>, vector<32x128xf32>, vector<16x128xf32> -> vector<16x128xf32>
    %c0_3 = arith.constant 0 : index
    %c0_4 = arith.constant 0 : index
    %3 = vector.load %arg3[%c0_3, %c0_4] : memref<1x128xf32, #tpu.memory_space<vmem>>, vector<1x128xf32>
    %4 = vector.broadcast %3 : vector<1x128xf32> to vector<16x128xf32>
    %5 = arith.addf %2, %4 : vector<16x128xf32>
    %cst_5 = arith.constant 0.000000e+00 : f32
    %6 = vector.broadcast %cst_5 : f32 to vector<16x128xf32>
    %7 = arith.maximumf %5, %6 : vector<16x128xf32>
    %c0_6 = arith.constant 0 : index
    %c0_7 = arith.constant 0 : index
    %8 = vector.load %arg4[%c0_6, %c0_7] : memref<1x128xf32, #tpu.memory_space<vmem>>, vector<1x128xf32>
    %9 = vector.broadcast %8 : vector<1x128xf32> to vector<16x128xf32>
    %10 = arith.mulf %7, %9 : vector<16x128xf32>
    %cst_8 = arith.constant dense<0.000000e+00> : vector<16xf32>
    %11 = vector.multi_reduction <add>, %10, %cst_8 [1] : vector<16x128xf32> to vector<16xf32>
    %12 = vector.shape_cast %11 : vector<16xf32> to vector<16x1xf32>
    %c0_9 = arith.constant 0 : index
    %c0_10 = arith.constant 0 : index
    %13 = memref.load %arg5[%c0_9, %c0_10] : memref<1x1xf32, #tpu.memory_space<smem>>
    %14 = vector.broadcast %13 : f32 to vector<16x1xf32>
    %15 = arith.addf %12, %14 : vector<16x1xf32>
    %cst_11 = arith.constant 0.000000e+00 : f32
    %16 = vector.broadcast %cst_11 : f32 to vector<16x1xf32>
    %17 = arith.maximumf %15, %16 : vector<16x1xf32>
    %18 = arith.negf %17 : vector<16x1xf32>
    %19 = math.exp %18 : vector<16x1xf32>
    %cst_12 = arith.constant 1.000000e+00 : f32
    %20 = vector.broadcast %cst_12 : f32 to vector<16x1xf32>
    %21 = arith.addf %20, %19 : vector<16x1xf32>
    %22 = arith.divf %20, %21 : vector<16x1xf32>
    %c0_13 = arith.constant 0 : index
    %c0_14 = arith.constant 0 : index
    %23 = vector.load %arg6[%c0_13, %c0_14] : memref<16x1xf32, #tpu.memory_space<vmem>>, vector<16x1xf32>
    tpu.vector_store %arg6[%c0_13, %c0_14], %22 {strides = array<i32>} : memref<16x1xf32, #tpu.memory_space<vmem>>, vector<16x1xf32>,
    return
  }
  func.func @transform_0(%arg0: i32) -> (i32, i32) {
    %c0_i32 = arith.constant 0 : i32
    %c0_i32_0 = arith.constant 0 : i32
    return %arg0, %c0_i32 : i32, i32
  }
  func.func @transform_1(%arg0: i32) -> (i32, i32) {
    %c0_i32 = arith.constant 0 : i32
    %c0_i32_0 = arith.constant 0 : i32
    %c0_i32_1 = arith.constant 0 : i32
    return %c0_i32, %c0_i32_0 : i32, i32
  }
  func.func @transform_2(%arg0: i32) -> (i32, i32) {
    %c0_i32 = arith.constant 0 : i32
    %c0_i32_0 = arith.constant 0 : i32
    %c0_i32_1 = arith.constant 0 : i32
    return %c0_i32, %c0_i32_0 : i32, i32
  }
  func.func @transform_3(%arg0: i32) -> (i32, i32) {
    %c0_i32 = arith.constant 0 : i32
    %c0_i32_0 = arith.constant 0 : i32
    %c0_i32_1 = arith.constant 0 : i32
    return %c0_i32, %c0_i32_0 : i32, i32
  }
  func.func @transform_4(%arg0: i32) -> (i32, i32) {
    %c0_i32 = arith.constant 0 : i32
    %c0_i32_0 = arith.constant 0 : i32
    %c0_i32_1 = arith.constant 0 : i32
    return %c0_i32, %c0_i32_0 : i32, i32
  }
  func.func @transform_5(%arg0: i32) -> (i32, i32) {
    %c0_i32 = arith.constant 0 : i32
    %c0_i32_0 = arith.constant 0 : i32
    return %arg0, %c0_i32 : i32, i32
  }
}

</mosaic_0001>

<bundles_post_ra>
// kernel: discriminator_forward.1
= control target key start
LH: loop header
LB: loop body
LE: loop exit
PB: predicated region body
PF: predicated region fallthrough
CT: control target
= control target key end

     0   :  { %vm34_vm0 = vcmask 261120   ;;  %vm149_vm1 = vcmask 7168   ;;  %s258_s1 = inlined_call_operand.vmem [shape: f32[32,128], index: 1, kind: input, shape index: {}]   ;;  %s259_s0 = inlined_call_operand.vmem [shape: f32[16,32], index: 0, kind: input, shape index: {}]   ;;  %s260_s2 = inlined_call_operand.vmem [shape: f32[1,128], index: 2, kind: input, shape index: {}]   ;;  %s261_s3 = inlined_call_operand.vmem [shape: f32[1,128], index: 3, kind: input, shape index: {}]   ;;  %s262_s4 = inlined_call_operand.<no memory space> [shape: f32[1,1], index: 4, kind: input, shape index: {}]   ;;  %s263_s5 = inlined_call_operand.vmem [shape: f32[16,1], index: 5, kind: output, shape index: {}]  }
   0x1   :  { %v23_v0 = vld [vmem:[%s258_s1] sm:$0xff]  ;;  %v24_v1 = vld [vmem:[%s258_s1 + $0x8] sm:$0xff]  ;;  %v25_v2 = vld [vmem:[%s258_s1 + $0x10] sm:$0xff]  ;;  %v132_v18 = vstv %s262_s4 }
   0x2   :  { %v179_v3 = vpack.c.bf16 %v24_v1, %v23_v0  ;;  %v26_v4 = vld [vmem:[%s258_s1 + $0x18] sm:$0xff]  ;;  %v21_v5 = vld [vmem:[%s259_s0] sm:$0xff]  ;;  %v22_v7 = vld [vmem:[%s259_s0 + $0x8] sm:$0xff] }
   0x3   :  { %v183_v6 = vpack.c.bf16 %v26_v4, %v25_v2  ;;  %176 = vmatprep.mubr.msk.f32.mxu0 %vm34_vm0, %v21_v5  ;;  %v156_v8 = vld [vmem:[%s260_s2] ss:$0 sm:$0xff] }
   0x4   :  { %180 = vmatprep.subr.bf16.mxu0 %v179_v3  ;;  %v159_v13 = vld [vmem:[%s261_s3] ss:$0 sm:$0xff] }
   0x5   :  { %182 = vmatpush3.bf16.msra.mxu0 %v179_v3 }
   0x6   :  { %184 = vmatprep.subr.bf16.mxu0 %v183_v6 }
   0x9   :  { %186 = vmatpush3.bf16.msra.mxu0 %v183_v6 }
   0xc   :  { %177 = vmatmul.mubr.msk.f32.vlgmr.msra.gmra.mrb[0].mxu0 %vm34_vm0, %v22_v7 }
  0xdf   :  { %v178_v9 = vpop.f32.mrb[0].mxu0 }
  0xe0   :  { %v107_v10 = vpop.f32.mrb[1].mxu0  ;;  %v113_v11 = vadd.f32 %v178_v9, %v156_v8 }
  0xe1   :  { %v108_v12 = vadd.f32 %v156_v8, %v107_v10 }
  0xe2   :  { %v117_v15 = vmax.f32 %v113_v11, 0.0 }
  0xe3   :  { %v116_v14 = vmax.f32 %v108_v12, 0.0 }
  0xe4   :  { %v126_v17 = vmul.f32 %v159_v13, %v117_v15 }
  0xe5   :  { %v125_v16 = vmul.f32 %v159_v13, %v116_v14 }
  0xe7   :  { %127 = vadd.xlane.f32.xlu0 %v125_v16 }
  0xeb   :  { %129 = vadd.xlane.f32.xlu0 %v126_v17 }
 0x174   :  { %v128_v19 = vpop.xlane.xlu0 %127 }
 0x175   :  { %v133_v20 = vadd.f32 %v132_v18, %v128_v19 }
 0x177   :  { %v135_v21 = vmax.f32 %v133_v20, 0.0 }
 0x178   :  { %v130_v22 = vpop.xlane.xlu0 %129 }
 0x179   :  { %v160_v23 = vmul.f32 -1.442695, %v135_v21  ;;  %v134_v24 = vadd.f32 %v132_v18, %v130_v22 }
 0x17b   :  { %187 = vpow2.f32 %v160_v23  ;;  %v136_v25 = vmax.f32 %v134_v24, 0.0 }
 0x17d   :  { %v161_v26 = vmul.f32 -1.442695, %v136_v25 }
 0x17f   :  { %189 = vpow2.f32 %v161_v26 }
 0x185   :  { %v188_v27 = vpop.eup %187 }
 0x186   :  { %v143_v28 = vadd.f32 1.0, %v188_v27 }
 0x188   :  { %191 = vrcp.f32 %v143_v28 }
 0x189   :  { %v190_v29 = vpop.eup %189 }
 0x18a   :  { %v144_v30 = vadd.f32 1.0, %v190_v29 }
 0x18c   :  { %193 = vrcp.f32 %v144_v30 }
 0x192   :  { %v192_v31 = vpop.eup %191 }
 0x193   :  { %150 = vst.msk [vmem:[%s263_s5] sm:$0xff] %vm149_vm1, %v192_v31 }
 0x196   :  { %v194_v32 = vpop.eup %193 }
 0x197   :  { %151 = vst.msk [vmem:[%s263_s5 + $0x8] sm:$0xff] %vm149_vm1, %v194_v32 }

</bundles_post_ra>
